<compile_context>
chip_gen: v6e
topology: v6e:2x2x1
jax: 0.10.0
libtpu: 0.0.40
codegen_flags: <defaults>
</compile_context>

<pallas_src>
import numpy as np
import jax
import jax.numpy as jnp
from jax import lax
from jax.experimental import pallas as pl
from jax.experimental.pallas import tpu as pltpu

OUT_SIZE = (8, 16)  # out_channels C = 128 (lane-aligned)


# ----------------------------------------------------------------------------
# Parameter construction (mirrors Competitive.__init__)
# ----------------------------------------------------------------------------
def build_lfb_kernel(out_size, lfb_sigma=None):
    """Gaussian Chebyshev-distance kernel, exactly as built in Competitive.__init__."""
    out_size = np.asarray(out_size)
    map_radius = (out_size - 1) // 2
    sigma = float(map_radius.max()) if lfb_sigma is None else float(lfb_sigma)
    x0 = np.abs(np.arange(out_size[0]) - map_radius[0])
    x1 = np.abs(np.arange(out_size[1]) - map_radius[1])
    x = np.maximum(x0[:, None], x1[None, :])                          # Chebyshev distance
    kern = np.exp(-(x.astype(np.float32) ** 2) / (2.0 * sigma ** 2))  # LFB_GAUSS
    return kern, map_radius


def build_lfb_matrix(out_size, lfb_sigma=None):
    """(C, C) matrix M s.t. winner @ M == clampless conv2d(pad(winner), kern)."""
    H, W = out_size
    kern, mr = build_lfb_kernel(out_size, lfb_sigma)
    wi = np.arange(H)[:, None, None, None]
    wj = np.arange(W)[None, :, None, None]
    oi = np.arange(H)[None, None, :, None]
    oj = np.arange(W)[None, None, None, :]
    u = wi - oi + mr[0]
    v = wj - oj + mr[1]
    valid = (u >= 0) & (u < H) & (v >= 0) & (v < W)
    M4 = np.where(valid, kern[np.clip(u, 0, H - 1), np.clip(v, 0, W - 1)], 0.0)
    return jnp.asarray(M4.reshape(H * W, H * W).astype(np.float32))


# ----------------------------------------------------------------------------
# Pallas kernel
# ----------------------------------------------------------------------------
def competitive_kernel(y_ref, m_ref, o_ref):
    # y_ref: (TN, C) tile, m_ref: full (C, C) resident in VMEM, o_ref: (TN, C)
    y = y_ref[...]
    C = y.shape[1]
    # competitive_act, k=1: exactly ONE winner per row (first index of the max),
    # matching PyTorch topk/scatter semantics even under ties.
    row_max = jnp.max(y, axis=1, keepdims=True)
    is_max = y >= row_max
    col = lax.broadcasted_iota(jnp.int32, y.shape, 1)
    first = jnp.min(jnp.where(is_max, col, C), axis=1, keepdims=True)
    winner = (col == first).astype(jnp.float32)
    # lateral feedback: padded 'valid' conv2d with Gaussian kernel, as a matmul
    lfb = jnp.dot(winner, m_ref[...], preferred_element_type=jnp.float32)
    o_ref[...] = jnp.clip(lfb, -1.0, 1.0)


def _round_up(x, m):
    return (x + m - 1) // m * m


def _default_tile_n(n):
    n8 = _round_up(max(n, 1), 8)
    if n8 < 16:
        return n8
    # >= 2 grid steps so both v7x TensorCores get work under "parallel";
    # <= 1024 rows keeps the double-buffered in+out footprint ~2 MiB, well
    # inside the default scoped VMEM of v5e (16 MiB) / v6e / v7x (32 MiB).
    return min(1024, _round_up((n8 + 1) // 2, 8))


def competitive_forward(y, lfb_matrix, *, tile_n=None):
    N, C = y.shape
    assert lfb_matrix.shape == (C, C)
    if tile_n is None:
        tile_n = _default_tile_n(N)
    tile_n = max(8, _round_up(int(tile_n), 8))

    # Rows are independent: pad the batch up to a tile multiple (keeps the fast
    # unmasked full-tile path) and slice the padding off afterwards.
    n_pad = _round_up(N, tile_n)
    y_p = jnp.pad(y, ((0, n_pad - N), (0, 0))) if n_pad != N else y
    grid = (n_pad // tile_n,)

    # Per-step VMEM: double-buffered input + output tiles, plus the resident M.
    vmem_need = 4 * tile_n * C * 4 + C * C * 4
    cp_kwargs = dict(dimension_semantics=("parallel",))
    if vmem_need > (12 << 20):  # only override when the tile outgrows defaults
        cp_kwargs["vmem_limit_bytes"] = int(vmem_need + (4 << 20))

    cost = pl.CostEstimate(
        flops=2 * n_pad * C * C,
        transcendentals=0,
        bytes_accessed=2 * n_pad * C * 4 + C * C * 4,
    )

    out = pl.pallas_call(
        competitive_kernel,
        out_shape=jax.ShapeDtypeStruct((n_pad, C), jnp.float32),
        grid=grid,
        in_specs=[
            pl.BlockSpec((tile_n, C), lambda i: (i, 0)),
            # 64 KiB LFB matrix: fully resident in VMEM, not pipelined.
            pl.BlockSpec(memory_space=pltpu.MemorySpace.VMEM),
        ],
        out_specs=pl.BlockSpec((tile_n, C), lambda i: (i, 0)),
        compiler_params=pltpu.CompilerParams(**cp_kwargs),
        cost_estimate=cost,
    )(y_p, lfb_matrix)
    return out[:N]


# ----------------------------------------------------------------------------
# Pure-JAX reference mirroring the PyTorch forward (pad + conv2d path)
# ----------------------------------------------------------------------------
def reference_forward(y, out_size, lfb_sigma=None):
    N, C = y.shape
    H, W = out_size
    kern, mr = build_lfb_kernel(out_size, lfb_sigma)
    # k=1 topk -> exactly one winner per row (first index of the max)
    winner = jax.nn.one_hot(jnp.argmax(y, axis=1), C, dtype=jnp.float32)
    wm = winner.reshape(N, H, W)
    lfb_in = jnp.pad(
        wm, ((0, 0), (int(mr[0]), H - 1 - int(mr[0])), (int(mr[1]), W - 1 - int(mr[1]))))
    lfb_out = lax.conv_general_dilated(
        lfb_in[:, None, :, :], jnp.asarray(kern)[None, None, :, :],
        window_strides=(1, 1), padding="VALID")
    return jnp.clip(lfb_out, -1.0, 1.0).reshape(N, C)


if __name__ == "__main__":
    H, W = OUT_SIZE
    C = H * W          # 128
    key = jax.random.PRNGKey(0)

    lfb_matrix = build_lfb_matrix(OUT_SIZE)          # deterministic "parameter"

    # Main test: small batch, tile-aligned.
    N = 16
    y = jax.random.normal(key, (N, C), dtype=jnp.float32)
    out = jax.block_until_ready(competitive_forward(y, lfb_matrix))
    ref = jax.block_until_ready(reference_forward(y, OUT_SIZE))
    np.testing.assert_allclose(np.asarray(out), np.asarray(ref), rtol=1e-5, atol=1e-5)

    # Ragged batch: exercises the pad-and-slice remainder path.
    N2 = 50
    y2 = jax.random.normal(jax.random.PRNGKey(1), (N2, C), dtype=jnp.float32)
    out2 = jax.block_until_ready(competitive_forward(y2, lfb_matrix))
    ref2 = jax.block_until_ready(reference_forward(y2, OUT_SIZE))
    np.testing.assert_allclose(np.asarray(out2), np.asarray(ref2), rtol=1e-5, atol=1e-5)

    print("KERNEL_OK")
</pallas_src>

<mosaic_0001>
module attributes {stable_mosaic.version = 11 : i64} {
  func.func @competitive_kernel(%arg0: i32, %arg1: memref<8x128xf32, #tpu.memory_space<vmem>>, %arg2: memref<128x128xf32, #tpu.memory_space<vmem>>, %arg3: memref<8x128xf32, #tpu.memory_space<vmem>>) attributes {dimension_semantics = [#tpu.dimension_semantics<parallel>], iteration_bounds = array<i64: 2>, scalar_prefetch = 0 : i64, scratch_operands = 0 : i64, tpu.core_type = #tpu.core_type<tc>, window_params = [{transform_indices = @transform_0, window_bounds = array<i64: 8, 128>}, {pipeline_mode = #tpu.pipeline_mode<synchronous>, transform_indices = @transform_1, window_bounds = array<i64: 128, 128>}, {transform_indices = @transform_2, window_bounds = array<i64: 8, 128>}]} {
    %c0 = arith.constant 0 : index
    %c0_0 = arith.constant 0 : index
    %0 = vector.load %arg1[%c0, %c0_0] : memref<8x128xf32, #tpu.memory_space<vmem>>, vector<8x128xf32>
    %cst = arith.constant dense<0xFF800000> : vector<8xf32>
    %1 = vector.multi_reduction <maximumf>, %0, %cst [1] : vector<8x128xf32> to vector<8xf32>
    %2 = vector.shape_cast %1 : vector<8xf32> to vector<8x1xf32>
    %3 = vector.broadcast %2 : vector<8x1xf32> to vector<8x128xf32>
    %4 = arith.cmpf oge, %0, %3 : vector<8x128xf32>
    %5 = tpu.iota {dimensions = array<i32: 1>} : vector<8x128xi32>
    %c128_i32 = arith.constant 128 : i32
    %6 = vector.broadcast %c128_i32 : i32 to vector<8x128xi32>
    %7 = arith.select %4, %5, %6 : vector<8x128xi1>, vector<8x128xi32>
    %cst_1 = arith.constant dense<2147483647> : vector<8xi32>
    %8 = vector.multi_reduction <minsi>, %7, %cst_1 [1] : vector<8x128xi32> to vector<8xi32>
    %9 = vector.shape_cast %8 : vector<8xi32> to vector<8x1xi32>
    %10 = vector.broadcast %9 : vector<8x1xi32> to vector<8x128xi32>
    %11 = arith.cmpi eq, %5, %10 : vector<8x128xi32>
    %12 = arith.extui %11 : vector<8x128xi1> to vector<8x128xi32>
    %13 = arith.sitofp %12 : vector<8x128xi32> to vector<8x128xf32>
    %c0_2 = arith.constant 0 : index
    %c0_3 = arith.constant 0 : index
    %14 = vector.load %arg2[%c0_2, %c0_3] : memref<128x128xf32, #tpu.memory_space<vmem>>, vector<128x128xf32>
    %cst_4 = arith.constant dense<0.000000e+00> : vector<8x128xf32>
    %15 = tpu.matmul %13, %14, %cst_4 {dimension_numbers = #tpu.dot_dimension_numbers<[1], [0], [0], [1], [0, 0, 1, 1], [], []>} : vector<8x128xf32>, vector<128x128xf32>, vector<8x128xf32> -> vector<8x128xf32>
    %cst_5 = arith.constant -1.000000e+00 : f32
    %cst_6 = arith.constant 1.000000e+00 : f32
    %16 = vector.broadcast %cst_5 : f32 to vector<8x128xf32>
    %17 = arith.maximumf %16, %15 : vector<8x128xf32>
    %18 = vector.broadcast %cst_6 : f32 to vector<8x128xf32>
    %19 = arith.minimumf %18, %17 : vector<8x128xf32>
    %c0_7 = arith.constant 0 : index
    %c0_8 = arith.constant 0 : index
    %20 = vector.load %arg3[%c0_7, %c0_8] : memref<8x128xf32, #tpu.memory_space<vmem>>, vector<8x128xf32>
    tpu.vector_store %arg3[%c0_7, %c0_8], %19 {strides = array<i32>} : memref<8x128xf32, #tpu.memory_space<vmem>>, vector<8x128xf32>,
    return
  }
  func.func @transform_0(%arg0: i32) -> (i32, i32) {
    %c0_i32 = arith.constant 0 : i32
    %c0_i32_0 = arith.constant 0 : i32
    return %arg0, %c0_i32 : i32, i32
  }
  func.func @transform_1(%arg0: i32) -> (i32, i32) {
    %c0_i32 = arith.constant 0 : i32
    %c0_i32_0 = arith.constant 0 : i32
    %c0_i32_1 = arith.constant 0 : i32
    return %c0_i32, %c0_i32_0 : i32, i32
  }
  func.func @transform_2(%arg0: i32) -> (i32, i32) {
    %c0_i32 = arith.constant 0 : i32
    %c0_i32_0 = arith.constant 0 : i32
    return %arg0, %c0_i32 : i32, i32
  }
}

</mosaic_0001>

<bundles_post_ra>
// kernel: tpu_custom_call.1
= control target key start
LH: loop header
LB: loop body
LE: loop exit
PB: predicated region body
PF: predicated region fallthrough
CT: control target
= control target key end

     0   :  { %7 = vsyncpa [#allocation3], 0  ;;  %s827_s0 = inlined_call_operand.hbm [shape: f32[16,128], index: 0, kind: input, shape index: {}]   ;;  %s828_s1 = inlined_call_operand.hbm [shape: f32[128,128], index: 1, kind: input, shape index: {}]   ;;  %s829_s2 = inlined_call_operand.hbm [shape: f32[16,128], index: 2, kind: output, shape index: {}]  }
   0x1   :  { %9 = vsyncpa [#allocation3 + $0x1], 0 }
   0x2   :  { %10 = vsyncpa [#allocation6], 0 }
   0x3   :  { %11 = vsyncpa [#allocation4], 0 }
   0x4   :  { %13 = vsyncpa [#allocation4 + $0x1], 0  ;;  %s659_s9 = smov 0   ;;  %s661_s10 = smov 0  }
   0x5   :  { %s663_s11 = smov 0   ;;  %s665_s12 = smov 0  }
   0x6 LB: > { %s680_s13 = sadd.s32 4294967295, %s634_s12   ;;  %s381_s14 = sadd.s32 4294967294, %s634_s12   ;;  %s634_s12 = sphi %s665_s12, %s851_s12   ;;  %s630_s11 = sphi %s663_s11, %s850_s11   ;;  %s626_s10 = sphi %s661_s10, %s849_s10   ;;  %s622_s9 = sphi %s659_s9, %s848_s9  }
   0x7   : > { %p39_p0 = scmp.ne.s32.totalorder %s626_s10, %s622_s9  ;;  %p830_p1 = scmp.eq.s32.totalorder %s680_s13, 0 }
   0x8   : > { %p90_p3 = scmp.eq.s32.totalorder %s381_s14, 1  ;;  %p382_p5 = scmp.ge.s32.totalorder %s634_s12, 1 }
   0x9   : > { %p689_p4 = por %p830_p1, %p39_p0  ;;  %p97_p7 = scmp.lt.s32.totalorder %s634_s12, 3 }
   0xa   : > { %p694_p6 = por %p90_p3, %p39_p0  ;;  %s636_s18 = smov [#allocation5]  }
   0xb   : > { %s834_s15 = scalar_select %p689_p4, 1, 0 }
   0xc   : > { %s835_s16 = scalar_select %p694_p6, 1, 0 }
   0xd   : > { %p699_p8 = pnand %p382_p5, %p97_p7  ;;  %s109_s19 = sshll.u32 %s636_s18, 4  ;;  %s110_s19 = int_to_ptr.vmem [resolvable:$true] %s109_s19 }
   0xe   : > { %s713_s21 = sadd.s32 1, %s634_s12   ;;  %s26_s22 = sadd.s32 1, %s630_s11 }
   0xf   : > { %s836_s17 = scalar_select %p699_p8, 1, 0 }
  0x10   : > { %p458_p9 = pneg %p699_p8  ;;  %s23_s23 = ssub.s32 %s634_s12, %s713_s21 }
  0x11   : > { %s523_s24 = scalar_lea.vmem %s110_s19, 2048  ;;  %p531_p5 = scmp.lt.s32.totalorder %s110_s19, %s110_s19 }
  0x12   : > { %p708_p11 = pnand %p458_p9, %p830_p1  ;;  %p524_p13 = scmp.ne.s32.totalorder %s110_s19, %s523_s24 }
  0x13   : > { %p532_p7 = scmp.lt.s32.totalorder %s523_s24, %s523_s24 }
  0x14   : > { %p514_p12 = pneg %p708_p11 }
  0x15   : > { %p533_p10 = por %p532_p7, %p531_p5 }
  0x16   : > { %p526_p0 = pnand %p524_p13, %p514_p12 }
  0x18   : > { %p527_p3 = pneg %p526_p0 }
  0x1a   : > { %p534_p2 = pnand %p533_p10, %p527_p3 }
  0x1c   : > { %537 = shalt.err (!%p534_p2)
}
  0x1d   : > { %s637_s25 = smov 128   ;;  %s638_s26 = smov 8  }
  0x1e   : > { %461 = dma.hbm_to_vmem [thread:$0]  (!%p708_p11), %s828_s1, 2048, %s110_s19, [#allocation6], %s637_s25, %s637_s25, %s638_s26  }
  0x1f   : > { %p24_p9 = scmp.eq.s32.totalorder %s23_s23, 0  ;;  %p33_p12 = scmp.ne.s32.totalorder %s630_s11, %s626_s10 }
  0x20   : > { %p34_p10 = scmp.eq.s32.totalorder %s634_s12, 0  ;;  %p471_p2 = scmp.lt.s32.totalorder %s634_s12, 2 }
  0x21   : > { %s730_s29 = scalar_select %p24_p9, %s630_s11, %s26_s22  }
  0x22   : > { %p35_p13 = por %p34_p10, %p33_p12  ;;  %p838_p0 = scmp.eq.s32.totalorder %s680_s13, 1 }
  0x23   : > { %s123_s3 = sand.u32 1, %s630_s11   ;;  %s386_s4 = sshll.u32 %s634_s12, 7 }
  0x24   : > { %p734_p3 = por %p838_p0, %p33_p12  ;;  %s385_s5 = sshll.u32 %s123_s3, 3 }
  0x25   : > { %s743_s8 = scalar_lea.hbm %s827_s0, %s386_s4  ;;  %s127_s14 = scalar_lea.vmem [#allocation2], %s385_s5 }
  0x26   : > { %s839_s30 = scalar_select %p734_p3, 1, 0 }
  0x27   : > { %s134_s18 = sshll.u32 %s127_s14, 4  ;;  %p745_p11 = pnand %p471_p2, %p35_p13  ;;  %s135_s18 = int_to_ptr.vmem [resolvable:$true] %s134_s18 }
  0x28   : > { %s124_s20 = scalar_lea.sflag [#allocation3], %s123_s3  ;;  %s538_s22 = scalar_lea.hbm %s743_s8, 128 }
  0x29   : > { %p539_p5 = scmp.ne.s32.totalorder %s743_s8, %s538_s22  ;;  %p540_p7 = pneg %p745_p11 }
  0x2a   : > { %s543_s25 = scalar_lea.hbm %s827_s0, 256  ;;  %p544_p10 = scmp.lt.s32.totalorder %s743_s8, %s827_s0 }
  0x2b   : > { %p541_p9 = pnand %p540_p7, %p539_p5  ;;  %p545_p2 = scmp.lt.s32.totalorder %s543_s25, %s538_s22 }
  0x2d   : > { %p542_p12 = pneg %p541_p9  ;;  %p546_p13 = por %p545_p2, %p544_p10 }
  0x2f   : > { %p547_p0 = pnand %p546_p13, %p542_p12 }
  0x31   : > { %550 = shalt.err (!%p547_p0)
}
  0x32   : > { %s551_s28 = scalar_lea.vmem %s135_s18, 128  ;;  %s639_s3 = smov [#allocation2]  }
  0x33   : > { %p552_p1 = scmp.ne.s32.totalorder %s135_s18, %s551_s28  ;;  %s556_s4 = sshll.u32 %s639_s3, 4  ;;  %s557_s4 = int_to_ptr.vmem [resolvable:$false] %s556_s4 }
  0x34   : > { %s558_s5 = scalar_lea.vmem %s557_s4, 256  ;;  %p559_p5 = scmp.lt.s32.totalorder %s135_s18, %s557_s4 }
  0x35   : > { %p554_p6 = pnand %p552_p1, %p540_p7  ;;  %p560_p9 = scmp.lt.s32.totalorder %s558_s5, %s551_s28 }
  0x37   : > { %p555_p3 = pneg %p554_p6  ;;  %p561_p4 = por %p560_p9, %p559_p5 }
  0x39   : > { %p562_p8 = pnand %p561_p4, %p555_p3 }
  0x3b   : > { %565 = shalt.err (!%p562_p8)
}
  0x3c   : > { %465 = dma.hbm_to_vmem [thread:$0]  (!%p745_p11), %s743_s8, 128, %s135_s18, %s124_s20  }
  0x3d   : > { %p841_p12 = scmp.ne.s32.totalorder %s836_s17, 0 }
  0x3e   : > { %s766_s6 = sand.u32 (!%p841_p12), 1, %s626_s10   ;;  %p842_p1 = scmp.ne.s32.totalorder (!%p841_p12), %s834_s15, 0 }
  0x3f   : > { %143 = sbr.rel (%p841_p12) target bundleno = 708 (0x2c4), region = 28  ;;  %s388_s7 = sshll.u32 (!%p841_p12), %s766_s6, 3 }
  0x40   : > { %s146_s14 = scalar_lea.sflag (!%p841_p12), [#allocation3], %s766_s6  ;;  %s149_s22 = scalar_lea.vmem (!%p841_p12), [#allocation2], %s388_s7 }
  0x44   : > { %609 = dma.done.wait (%p842_p1), %s146_s14, 128  }
  0x45   : > { %611 = vsyncadd (%p842_p1), %s146_s14, 4294967168  ;;  %p843_p4 = scmp.eq.s32.totalorder %s680_s13, 0 }
  0x47   : > { %613 = dma.done.wait (%p843_p4), [#allocation6], 2048   ;;  %p844_p6 = pmov %p843_p4 }
  0x48   : > { %v174_v0 = vld [vmem:[%s149_s22] sm:$0xff]  ;;  %v178_v1 = vlaneseq  ;;  %v640_v8 = vmov 0.0   ;;  %v211_v10 = vld [vmem:[#allocation5 + $0x68] sm:$0xff]  ;;  %v210_v11 = vld [vmem:[#allocation5 + $0x60] sm:$0xff]  ;;  %vm641_vm2 = vmmov 0   ;;  %v642_v33 = vmov 1.0  }
  0x49   : > { %615 = vsyncadd (%p844_p6), [#allocation6], 4294965248  ;;  %175 = vmax.xlane.f32.xlu0 %v174_v0  ;;  %v213_v7 = vld [vmem:[#allocation5 + $0x78] sm:$0xff]  ;;  %415 = vmatprep.subr.mxu0 %v640_v8  ;;  %v212_v9 = vld [vmem:[#allocation5 + $0x70] sm:$0xff]  ;;  %s395_s15 = sshll.u32 %s680_s13, 7  ;;  %s173_s17 = scalar_lea.vmem [#allocation7], %s388_s7 }
  0x4a   : > { %v780_v2 = vand.u32 127, %v178_v1  ;;  %416 = vmatpush3.msra.mxu0 %v213_v7  ;;  %v209_v12 = vld [vmem:[#allocation5 + $0x58] sm:$0xff]  ;;  %v208_v13 = vld [vmem:[#allocation5 + $0x50] sm:$0xff]  ;;  %v207_v14 = vld [vmem:[#allocation5 + $0x48] sm:$0xff]  ;;  %447 = vmatprep.mubr.msk.f32.mxu0 %vm641_vm2, %v640_v8  ;;  %s301_s8 = sshll.u32 %s173_s17, 4  ;;  %s790_s20 = scalar_lea.hbm %s829_s2, %s395_s15  ;;  %s302_s8 = int_to_ptr.vmem [resolvable:$true] %s301_s8 }
  0x4b   : > { %417 = vmatprep.subr.mxu0 %v640_v8  ;;  %v206_v15 = vld [vmem:[#allocation5 + $0x40] sm:$0xff]  ;;  %v205_v16 = vld [vmem:[#allocation5 + $0x38] sm:$0xff]  ;;  %v204_v17 = vld [vmem:[#allocation5 + $0x30] sm:$0xff]  ;;  %s288_s23 = scalar_lea.sflag [#allocation4], %s766_s6  ;;  %s566_s24 = scalar_lea.vmem %s302_s8, 128 }
  0x4c   : > { %418 = vmatpush3.msra.mxu0 %v212_v9  ;;  %v203_v18 = vld [vmem:[#allocation5 + $0x28] sm:$0xff]  ;;  %v202_v19 = vld [vmem:[#allocation5 + $0x20] sm:$0xff]  ;;  %v201_v20 = vld [vmem:[#allocation5 + $0x18] sm:$0xff]  ;;  %p567_p8 = scmp.ne.s32.totalorder %s302_s8, %s566_s24  ;;  %p845_p3 = scmp.ne.s32.totalorder %s839_s30, 0 }
  0x4d   : > { %419 = vmatprep.subr.mxu0 %v640_v8  ;;  %v200_v25 = vld [vmem:[#allocation5 + $0x10] sm:$0xff]  ;;  %v199_v26 = vld [vmem:[#allocation5 + $0x8] sm:$0xff]  ;;  %v198_v27 = vld [vmem:[#allocation5] sm:$0xff]  ;;  %s643_s13 = smov [#allocation7]  }
  0x4e   : > { %420 = vmatpush3.msra.mxu0 %v211_v10  ;;  %p568_p11 = pnand %p567_p8, %p845_p3  ;;  %s570_s25 = sshll.u32 %s643_s13, 4  ;;  %s571_s25 = int_to_ptr.vmem [resolvable:$false] %s570_s25 }
  0x4f   : > { %421 = vmatprep.subr.mxu0 %v640_v8  ;;  %s572_s26 = scalar_lea.vmem %s571_s25, 256  ;;  %p573_p10 = scmp.lt.s32.totalorder %s302_s8, %s571_s25 }
  0x50   : > { %422 = vmatpush3.msra.mxu0 %v210_v11  ;;  %p569_p7 = pneg %p568_p11  ;;  %p574_p2 = scmp.lt.s32.totalorder %s572_s26, %s566_s24 }
  0x51   : > { %423 = vmatprep.subr.mxu0 %v640_v8 }
  0x52   : > { %424 = vmatpush3.msra.mxu0 %v209_v12  ;;  %p575_p13 = por %p574_p2, %p573_p10 }
  0x53   : > { %425 = vmatprep.subr.mxu0 %v640_v8 }
  0x54   : > { %426 = vmatpush3.msra.mxu0 %v208_v13  ;;  %p576_p0 = pnand %p575_p13, %p569_p7 }
  0x55   : > { %427 = vmatprep.subr.mxu0 %v640_v8 }
  0x56   : > { %428 = vmatpush3.msra.mxu0 %v207_v14 }
  0x57   : > { %429 = vmatprep.subr.mxu0 %v640_v8 }
  0x58   : > { %430 = vmatpush3.msra.mxu0 %v206_v15 }
  0x59   : > { %431 = vmatprep.subr.mxu0 %v640_v8 }
  0x5a   : > { %432 = vmatpush3.msra.mxu0 %v205_v16 }
  0x5b   : > { %433 = vmatprep.subr.mxu0 %v640_v8 }
  0x5c   : > { %434 = vmatpush3.msra.mxu0 %v204_v17 }
  0x5d   : > { %435 = vmatprep.subr.mxu0 %v640_v8 }
  0x5e   : > { %436 = vmatpush3.msra.mxu0 %v203_v18 }
  0x5f   : > { %437 = vmatprep.subr.mxu0 %v640_v8 }
  0x60   : > { %438 = vmatpush3.msra.mxu0 %v202_v19 }
  0x61   : > { %439 = vmatprep.subr.mxu0 %v640_v8 }
  0x62   : > { %440 = vmatpush3.msra.mxu0 %v201_v20 }
  0x63   : > { %441 = vmatprep.subr.mxu0 %v640_v8 }
  0x64   : > { %442 = vmatpush3.msra.mxu0 %v200_v25 }
  0x65   : > { %443 = vmatprep.subr.mxu0 %v640_v8 }
  0x66   : > { %444 = vmatpush3.msra.mxu0 %v199_v26 }
  0x67   : > { %445 = vmatprep.subr.mxu0 %v640_v8 }
  0x68   : > { %446 = vmatpush3.msra.mxu0 %v198_v27 }
  0xd2   : > { %v176_v3 = vpop.xlane.xlu0 %175 }
  0xd3   : > { %vm177_vm0 = vcmp.ge.f32.partialorder %v174_v0, %v176_v3 }
  0xd4   : > { %v180_v4 = vsel %vm177_vm0, %v780_v2, 128 }
  0xd5   : > { %v182_v5 = vshra.s32 %v180_v4, 16  ;;  %v181_v21 = vand.u32 65535, %v180_v4 }
  0xd7   : > { %v184_v6 = vcvt.s32.f32 %v182_v5  ;;  %v183_v23 = vcvt.s32.f32 %v181_v21 }
  0xd9   : > { %185 = vmin.xlane.f32.xlu0 %v184_v6 }
 0x162   : > { %v186_v22 = vpop.xlane.xlu0 %185 }
 0x163   : > { %vm187_vm1 = vcmp.eq.f32.partialorder %v184_v6, %v186_v22  ;;  %v192_v28 = vcvt.f32.s32 %v186_v22 }
 0x164   : > { %v188_v24 = vsel %vm187_vm1, %v183_v23, inf }
 0x165   : > { %189 = vmin.xlane.f32.xlu1 %v188_v24  ;;  %v193_v30 = vshll.u32 %v192_v28, 16 }
 0x1ee   : > { %v190_v29 = vpop.xlane.xlu1 %189 }
 0x1ef   : > { %v191_v31 = vcvt.f32.s32 %v190_v29 }
 0x1f1   : > { %v194_v32 = vadd.s32 %v193_v30, %v191_v31 }
 0x1f3   : > { %vm195_vm3 = vcmp.eq.s32.totalorder %v780_v2, %v194_v32 }
 0x1f4   : > { %448 = vmatmul.mubr.msk.f32.vlgmr.msra.gmra.mxu0 %vm195_vm3, %v642_v33 }
 0x2b4   : > { %v280_v34 = vpop.f32.mrf.mxu0 }
 0x2b5   : > { %v393_v35 = vclamps-f32 %v280_v34, 1.0 }
 0x2b6   : > { %v449_v36 = vpop.f32.mrf.mxu0 }
 0x2b7   : > { %286 = vst [vmem:[%s173_s17] sm:$0xff] %v393_v35 }
 0x2b8   : > { %579 = shalt.err (!%p576_p0)
}
 0x2b9   : > { %s580_s27 = scalar_lea.hbm %s790_s20, 128  ;;  %s584_s4 = scalar_lea.hbm %s829_s2, 256 }
 0x2ba   : > { %p581_p5 = scmp.ne.s32.totalorder %s790_s20, %s580_s27  ;;  %p585_p1 = scmp.lt.s32.totalorder %s790_s20, %s829_s2 }
 0x2bb   : > { %p586_p4 = scmp.lt.s32.totalorder %s584_s4, %s580_s27 }
 0x2bc   : > { %p582_p9 = pnand %p581_p5, %p845_p3 }
 0x2bd   : > { %p587_p6 = por %p586_p4, %p585_p1 }
 0x2be   : > { %p583_p12 = pneg %p582_p9 }
 0x2c0   : > { %p588_p8 = pnand %p587_p6, %p583_p12 }
 0x2c2   : > { %591 = shalt.err (!%p588_p8)
}
 0x2c3   : > { %456 = dma.vmem_to_hbm [thread:$0]  (%p845_p3), %s302_s8, 128, %s790_s20, %s288_s23  }
 0x2c4 PF: > { %s313_s7 = sand.u32 1, %s622_s9   ;;  %p846_p11 = scmp.ne.s32.totalorder %s835_s16, 0 }
 0x2c5   : > { %p847_p7 = scmp.ge.s32.totalorder %s634_s12, 2  ;;  %s314_s14 = scalar_lea.sflag [#allocation4], %s313_s7 }
 0x2c7   : > { %p467_p10 = pnand %p847_p7, %p846_p11 }
 0x2c9   : > { %p468_p2 = pneg %p467_p10 }
 0x2cb   : > { %617 = dma.done.wait (%p468_p2), %s314_s14, 128  }
 0x2cc   : > { %619 = vsyncadd (%p468_p2), %s314_s14, 4294967168  ;;  %p16_p13 = scmp.ge.s32.totalorder %s713_s21, 4   ;;  %s848_s9 = smov %s626_s10 }
 0x2cd   : > { %s849_s10 = smov %s630_s11  ;;  %s850_s11 = smov %s730_s29 }
 0x2ce   : > { %s851_s12 = smov %s713_s21  ;;  %18 = sbr.rel (!%p16_p13) target bundleno = 6 (0x6), region = 77 }
 0x2d3   :  { %319 = vsyncpa [#allocation3], 1 }
 0x2d4   :  { %321 = vsyncpa [#allocation3 + $0x1], 1 }
 0x2d5   :  { %322 = vsyncpa [#allocation6], 1 }
 0x2d6   :  { %323 = vsyncpa [#allocation4], 1 }
 0x2d7   :  { %325 = vsyncpa [#allocation4 + $0x1], 1 }

</bundles_post_ra>
